<compile_context>
chip_gen: v7x
topology: tpu7x:2x2x1
jax: 0.10.0
libtpu: 0.0.40
codegen_flags: <defaults>
</compile_context>

<pallas_src>
import jax
import jax.numpy as jnp
import numpy as np
from jax import lax
from jax.experimental import pallas as pl
from jax.experimental.pallas import tpu as pltpu

BN_EPS = 1e-5
LANE = 128


def _round_up(x, m):
    return ((x + m - 1) // m) * m


# ----------------------------- Pallas kernels ------------------------------

def _matmul_bias_kernel(x_ref, w_ref, b_ref, o_ref):
    # Single-K-tile specialization: bf16 x bf16 -> f32 on the MXU, bias, store.
    acc = jnp.dot(x_ref[...], w_ref[...], preferred_element_type=jnp.float32)
    o_ref[...] = (acc + b_ref[...]).astype(o_ref.dtype)


def _matmul_bias_acc_kernel(x_ref, w_ref, b_ref, o_ref, acc_ref):
    # General K-tiled fallback (not exercised at this model's sizes).
    @pl.when(pl.program_id(2) == 0)
    def _():
        acc_ref[...] = jnp.zeros_like(acc_ref)

    acc_ref[...] += jnp.dot(x_ref[...], w_ref[...],
                            preferred_element_type=jnp.float32)

    @pl.when(pl.program_id(2) == pl.num_programs(2) - 1)
    def _():
        o_ref[...] = (acc_ref[...] + b_ref[...]).astype(o_ref.dtype)


_MM_PARAMS_2D = pltpu.CompilerParams(
    dimension_semantics=("parallel", "parallel"),
    vmem_limit_bytes=32 * 1024 * 1024)

_MM_PARAMS_3D = pltpu.CompilerParams(
    dimension_semantics=("parallel", "parallel", "arbitrary"),
    vmem_limit_bytes=32 * 1024 * 1024)


# --------------------------- Pallas call wrapper ----------------------------

def matmul_bias(x, w_pre, b_pre, m_true, out_dtype=jnp.float32,
                *, tm=256, tn=128, tk_max=512):
    """(N,K) @ (K,Mp) + b.  `w_pre`/`b_pre` are pre-padded (Mp = 128-multiple)
    bf16/f32 weights from prepare_params.  Only activation rows are padded.

    N <= tm keeps grid_m == 1 at this model's sizes; tm stays <= 256 so the
    per-step VMEM footprint is tiny on every generation (incl. v7x's 64 MiB).
    """
    N, K = x.shape
    Kw, Mp = w_pre.shape
    assert Kw == K and b_pre.shape == (1, Mp)

    tm = min(tm, _round_up(N, 8))
    tn = min(tn, Mp)
    Np = _round_up(N, tm)

    xb = x.astype(jnp.bfloat16)
    if Np != N:
        xb = jnp.pad(xb, ((0, Np - N), (0, 0)))

    grid_m, grid_n = Np // tm, Mp // tn
    out_isz = jnp.dtype(out_dtype).itemsize

    if K <= tk_max:
        out = pl.pallas_call(
            _matmul_bias_kernel,
            out_shape=jax.ShapeDtypeStruct((Np, Mp), out_dtype),
            grid=(grid_m, grid_n),
            in_specs=[pl.BlockSpec((tm, K), lambda i, j: (i, 0)),
                      pl.BlockSpec((K, tn), lambda i, j: (0, j)),
                      pl.BlockSpec((1, tn), lambda i, j: (0, j))],
            out_specs=pl.BlockSpec((tm, tn), lambda i, j: (i, j)),
            compiler_params=_MM_PARAMS_2D,
            cost_estimate=pl.CostEstimate(
                flops=2 * Np * Mp * K, transcendentals=0,
                bytes_accessed=Np * K * 2 + K * Mp * 2 + Np * Mp * out_isz),
        )(xb, w_pre, b_pre)
    else:
        tk = tk_max
        Kp = _round_up(K, tk)
        xb = jnp.pad(xb, ((0, 0), (0, Kp - K)))
        wb = jnp.pad(w_pre, ((0, Kp - K), (0, 0)))
        out = pl.pallas_call(
            _matmul_bias_acc_kernel,
            out_shape=jax.ShapeDtypeStruct((Np, Mp), out_dtype),
            grid=(grid_m, grid_n, Kp // tk),
            in_specs=[pl.BlockSpec((tm, tk), lambda i, j, k: (i, k)),
                      pl.BlockSpec((tk, tn), lambda i, j, k: (k, j)),
                      pl.BlockSpec((1, tn), lambda i, j, k: (0, j))],
            out_specs=pl.BlockSpec((tm, tn), lambda i, j, k: (i, j)),
            scratch_shapes=[pltpu.VMEM((tm, tn), jnp.float32)],
            compiler_params=_MM_PARAMS_3D,
            cost_estimate=pl.CostEstimate(
                flops=2 * Np * Mp * Kp, transcendentals=0,
                bytes_accessed=Np * Kp * 2 + Kp * Mp * 2 + Np * Mp * out_isz),
        )(xb, wb, b_pre)

    return out[:N, :m_true]


# ------------- BN(train) + ReLU + ConvTranspose2d(4,2,1) per block ----------

def gen_block(x_nhwc, blk, out_dtype):
    """One generator block: BatchNorm(train) -> ReLU -> k=4/s=2/p=1 deconv.

    The deconv is lowered by sub-pixel decomposition: one matmul with
    K = 4*Cin on 2x2 stride-1 patches of the (pad=1) activated input produces
    the 4 output phases packed on lanes (M = 4*Cout), followed by a cheap
    depth-to-space interleave.  BN stats / affine / ReLU / patch extraction are
    tiny XLA-fused ops; the single pallas_call per block is the matmul.
    """
    B, H, W, Cin = x_nhwc.shape
    yf = x_nhwc.astype(jnp.float32)

    # Two-pass per-channel moments in f32 (exact match to the reference).
    mean = jnp.mean(yf, axis=(0, 1, 2))
    var = jnp.mean(jnp.square(yf - mean), axis=(0, 1, 2))
    scale = blk["gamma"] * lax.rsqrt(var + BN_EPS)
    shift = blk["beta"] - mean * scale

    # Affine + ReLU applied BEFORE zero-padding -> pad border stays exactly 0.
    a = jnp.maximum(yf * scale + shift, 0.0).astype(jnp.bfloat16)
    ap = jnp.pad(a, ((0, 0), (1, 1), (1, 1), (0, 0)))

    # 2x2 stride-1 patches at every window position; K-order = (dh, dw, ci).
    patches = jnp.concatenate(
        [ap[:, dh:dh + H + 1, dw:dw + W + 1, :] for dh in (0, 1) for dw in (0, 1)],
        axis=-1)                                            # (B, H+1, W+1, 4*Cin)
    q = patches.reshape(B * (H + 1) * (W + 1), 4 * Cin)

    out = matmul_bias(q, blk["w"], blk["b"], blk["m"], out_dtype)
    cout = blk["cout"]
    out6 = out.reshape(B, H + 1, W + 1, 2, 2, cout)         # (..., rh, rw, co)

    # y[2p+rh, 2q+rw] = out6[p+rh, q+rw, rh, rw]  (phase interleave, XLA glue).
    e00 = out6[:, :H, :W, 0, 0, :]
    e01 = out6[:, :H, 1:, 0, 1, :]
    e10 = out6[:, 1:, :W, 1, 0, :]
    e11 = out6[:, 1:, 1:, 1, 1, :]
    row0 = jnp.stack([e00, e01], axis=-2)                   # (B,H,W,2(rw),C)
    row1 = jnp.stack([e10, e11], axis=-2)
    y = jnp.stack([row0, row1], axis=2)                     # (B,H,2(rh),W,2(rw),C)
    return y.reshape(B, 2 * H, 2 * W, cout)


# ------------------------------ Generator ----------------------------------

def build_gen_layer_dims(side, num_channels):
    # Mirrors CTAB-GAN's determine_layers_gen.
    layer_dims = [(1, side), (num_channels, side // 2)]
    while layer_dims[-1][1] > 3 and len(layer_dims) < 4:
        layer_dims.append((layer_dims[-1][0] * 2, layer_dims[-1][1] // 2))
    return layer_dims


def init_generator_params(key, random_dim, side, num_channels):
    layer_dims = build_gen_layer_dims(side, num_channels)
    keys = iter(jax.random.split(key, 64))
    nrm = lambda shape, s=0.02: s * jax.random.normal(next(keys), shape, jnp.float32)

    params = {
        "head": {  # ConvTranspose2d(random_dim, C_last, k=side_last, 1, 0, bias=False)
            "w": nrm((random_dim, layer_dims[-1][0], layer_dims[-1][1], layer_dims[-1][1])),
        },
        "blocks": [],
    }
    for prev, curr in zip(reversed(layer_dims), list(reversed(layer_dims))[1:]):
        params["blocks"].append({
            "gamma": 1.0 + nrm((prev[0],)),
            "beta": nrm((prev[0],)),
            "w": nrm((prev[0], curr[0], 4, 4)),   # ConvTranspose2d(prev, curr, 4, 2, 1)
            "b": nrm((curr[0],)),
        })
    return params


def prepare_params(params):
    """Precompute matmul-ready weights once: permute / phase-pack, pad the
    output (M) dim to a lane multiple, cast to bf16.  Biases pre-padded f32."""
    w = params["head"]["w"]                                 # (Cin, Cout, k, k)
    cin, cout, k, _ = w.shape
    m = k * k * cout
    mp = _round_up(m, LANE)
    head_mat = jnp.transpose(w, (0, 2, 3, 1)).reshape(cin, m)
    head_mat = jnp.pad(head_mat, ((0, 0), (0, mp - m))).astype(jnp.bfloat16)
    prep = {"head": {"w": head_mat,
                     "b": jnp.zeros((1, mp), jnp.float32),
                     "m": m, "k": int(k), "cout": int(cout)},
            "blocks": []}

    # Sub-kernel tap selection: output phase r uses kernel taps [3,1]/[2,0]
    # for the two patch rows/cols (derived from oh = 2*ih - 1 + kh).
    sel = jnp.array([[3, 1], [2, 0]], dtype=jnp.int32)      # [r][d]
    for blk in params["blocks"]:
        wb = blk["w"]                                       # (Cin, Cout, 4, 4)
        ci, co, _, _ = wb.shape
        wp = jnp.transpose(wb, (2, 3, 0, 1))                # (kh, kw, Cin, Cout)
        sub = wp[sel][:, :, sel]                            # (rh, dh, rw, dw, Ci, Co)
        sub = jnp.transpose(sub, (1, 3, 4, 0, 2, 5))        # (dh, dw, Ci, rh, rw, Co)
        m = 4 * co
        mp_b = _round_up(m, LANE)
        w_mat = sub.reshape(4 * ci, m)
        w_mat = jnp.pad(w_mat, ((0, 0), (0, mp_b - m))).astype(jnp.bfloat16)
        b4 = jnp.pad(jnp.tile(blk["b"], 4).astype(jnp.float32),
                     ((0, mp_b - m),)).reshape(1, mp_b)
        prep["blocks"].append({
            "gamma": blk["gamma"].astype(jnp.float32),
            "beta": blk["beta"].astype(jnp.float32),
            "w": w_mat, "b": b4, "m": m, "cout": int(co)})
    return prep


def generator_forward_pallas(prep, z_nchw):
    B = z_nchw.shape[0]
    z2 = z_nchw.reshape(B, -1)                              # (B, random_dim)

    # Head deconv on a 1x1 input == one dense matmul (bf16 output feeds BN).
    h = prep["head"]
    x = matmul_bias(z2, h["w"], h["b"], h["m"], out_dtype=jnp.bfloat16)
    x = x.reshape(B, h["k"], h["k"], h["cout"])             # NHWC

    n_blocks = len(prep["blocks"])
    for bi, blk in enumerate(prep["blocks"]):
        out_dtype = jnp.float32 if bi == n_blocks - 1 else jnp.bfloat16
        x = gen_block(x, blk, out_dtype)

    return jnp.transpose(x, (0, 3, 1, 2)).astype(jnp.float32)   # back to NCHW


# ----------------------- Pure-JAX reference (NCHW) --------------------------

def _conv_transpose_ref(x_nchw, w_ct, bias, stride, pad):
    Cin, Cout, k, _ = w_ct.shape
    w_conv = jnp.transpose(w_ct[:, :, ::-1, ::-1], (1, 0, 2, 3))  # (Cout, Cin, k, k)
    pe = k - 1 - pad
    y = lax.conv_general_dilated(
        x_nchw, w_conv, window_strides=(1, 1),
        padding=[(pe, pe), (pe, pe)], lhs_dilation=(stride, stride),
        dimension_numbers=("NCHW", "OIHW", "NCHW"),
        precision=lax.Precision.HIGHEST)
    if bias is not None:
        y = y + bias.reshape(1, -1, 1, 1)
    return y


def _bn_relu_ref(x_nchw, gamma, beta):
    mean = jnp.mean(x_nchw, axis=(0, 2, 3), keepdims=True)
    var = jnp.mean((x_nchw - mean) ** 2, axis=(0, 2, 3), keepdims=True)
    y = (x_nchw - mean) * lax.rsqrt(var + BN_EPS)
    y = y * gamma.reshape(1, -1, 1, 1) + beta.reshape(1, -1, 1, 1)
    return jnp.maximum(y, 0.0)


def generator_forward_ref(params, z_nchw):
    x = _conv_transpose_ref(z_nchw, params["head"]["w"], None, 1, 0)
    for blk in params["blocks"]:
        x = _bn_relu_ref(x, blk["gamma"], blk["beta"])
        x = _conv_transpose_ref(x, blk["w"], blk["b"], 2, 1)
    return x


# --------------------------------- main -------------------------------------

if __name__ == "__main__":
    BATCH, RANDOM_DIM, SIDE, NUM_CHANNELS = 2, 32, 16, 4

    key = jax.random.PRNGKey(0)
    k_params, k_noise = jax.random.split(key)
    params = init_generator_params(k_params, RANDOM_DIM, SIDE, NUM_CHANNELS)
    prep = prepare_params(params)

    # Latent noise, NCHW just like the PyTorch generator input.
    z = jax.random.normal(k_noise, (BATCH, RANDOM_DIM, 1, 1), jnp.float32)

    fwd = jax.jit(lambda zz: generator_forward_pallas(prep, zz))
    out = jax.block_until_ready(fwd(z))

    assert out.shape == (BATCH, 1, SIDE, SIDE), out.shape
    assert bool(jnp.all(jnp.isfinite(out)))

    ref = jax.block_until_ready(generator_forward_ref(params, z))
    # bf16 MXU inputs / bf16 intermediate activations with f32 accumulation and
    # f32 BN statistics -> slightly looser tolerance.
    np.testing.assert_allclose(np.asarray(out), np.asarray(ref), rtol=2e-2, atol=2e-2)

    print("KERNEL_OK")
</pallas_src>

<mosaic_0001>
module attributes {stable_mosaic.version = 11 : i64} {
  func.func @_matmul_bias_kernel(%arg0: i32, %arg1: i32, %arg2: memref<8x32xbf16, #tpu.memory_space<vmem>>, %arg3: memref<32x128xbf16, #tpu.memory_space<vmem>>, %arg4: memref<1x128xf32, #tpu.memory_space<vmem>>, %arg5: memref<8x128xbf16, #tpu.memory_space<vmem>>) attributes {dimension_semantics = [#tpu.dimension_semantics<parallel>, #tpu.dimension_semantics<parallel>], iteration_bounds = array<i64: 1, 1>, scalar_prefetch = 0 : i64, scratch_operands = 0 : i64, tpu.core_type = #tpu.core_type<tc>, window_params = [{transform_indices = @transform_0, window_bounds = array<i64: 8, 32>}, {transform_indices = @transform_1, window_bounds = array<i64: 32, 128>}, {transform_indices = @transform_2, window_bounds = array<i64: 1, 128>}, {transform_indices = @transform_3, window_bounds = array<i64: 8, 128>}]} {
    %c0 = arith.constant 0 : index
    %c0_0 = arith.constant 0 : index
    %0 = vector.load %arg2[%c0, %c0_0] : memref<8x32xbf16, #tpu.memory_space<vmem>>, vector<8x32xbf16>
    %c0_1 = arith.constant 0 : index
    %c0_2 = arith.constant 0 : index
    %1 = vector.load %arg3[%c0_1, %c0_2] : memref<32x128xbf16, #tpu.memory_space<vmem>>, vector<32x128xbf16>
    %cst = arith.constant dense<0.000000e+00> : vector<8x128xf32>
    %2 = tpu.matmul %0, %1, %cst {dimension_numbers = #tpu.dot_dimension_numbers<[1], [0], [0], [1], [0, 0, 1, 1], [], []>} : vector<8x32xbf16>, vector<32x128xbf16>, vector<8x128xf32> -> vector<8x128xf32>
    %c0_3 = arith.constant 0 : index
    %c0_4 = arith.constant 0 : index
    %3 = vector.load %arg4[%c0_3, %c0_4] : memref<1x128xf32, #tpu.memory_space<vmem>>, vector<1x128xf32>
    %4 = vector.broadcast %3 : vector<1x128xf32> to vector<8x128xf32>
    %5 = arith.addf %2, %4 : vector<8x128xf32>
    %6 = arith.truncf %5 : vector<8x128xf32> to vector<8x128xbf16>
    %c0_5 = arith.constant 0 : index
    %c0_6 = arith.constant 0 : index
    %7 = vector.load %arg5[%c0_5, %c0_6] : memref<8x128xbf16, #tpu.memory_space<vmem>>, vector<8x128xbf16>
    tpu.vector_store %arg5[%c0_5, %c0_6], %6 {strides = array<i32>} : memref<8x128xbf16, #tpu.memory_space<vmem>>, vector<8x128xbf16>,
    return
  }
  func.func @transform_0(%arg0: i32, %arg1: i32) -> (i32, i32) {
    %c0_i32 = arith.constant 0 : i32
    %c0_i32_0 = arith.constant 0 : i32
    return %arg0, %c0_i32 : i32, i32
  }
  func.func @transform_1(%arg0: i32, %arg1: i32) -> (i32, i32) {
    %c0_i32 = arith.constant 0 : i32
    %c0_i32_0 = arith.constant 0 : i32
    return %c0_i32, %arg1 : i32, i32
  }
  func.func @transform_2(%arg0: i32, %arg1: i32) -> (i32, i32) {
    %c0_i32 = arith.constant 0 : i32
    %c0_i32_0 = arith.constant 0 : i32
    return %c0_i32, %arg1 : i32, i32
  }
  func.func @transform_3(%arg0: i32, %arg1: i32) -> (i32, i32) {
    %c0_i32 = arith.constant 0 : i32
    return %arg0, %arg1 : i32, i32
  }
}

module attributes {stable_mosaic.version = 11 : i64} {
  func.func @_matmul_bias_kernel(%arg0: i32, %arg1: i32, %arg2: memref<24x64xbf16, #tpu.memory_space<vmem>>, %arg3: memref<64x128xbf16, #tpu.memory_space<vmem>>, %arg4: memref<1x128xf32, #tpu.memory_space<vmem>>, %arg5: memref<24x128xbf16, #tpu.memory_space<vmem>>) attributes {dimension_semantics = [#tpu.dimension_semantics<parallel>, #tpu.dimension_semantics<parallel>], iteration_bounds = array<i64: 1, 1>, scalar_prefetch = 0 : i64, scratch_operands = 0 : i64, tpu.core_type = #tpu.core_type<tc>, window_params = [{transform_indices = @transform_0, window_bounds = array<i64: 24, 64>}, {transform_indices = @transform_1, window_bounds = array<i64: 64, 128>}, {transform_indices = @transform_2, window_bounds = array<i64: 1, 128>}, {transform_indices = @transform_3, window_bounds = array<i64: 24, 128>}]} {
    %c0 = arith.constant 0 : index
    %c0_0 = arith.constant 0 : index
    %0 = vector.load %arg2[%c0, %c0_0] : memref<24x64xbf16, #tpu.memory_space<vmem>>, vector<24x64xbf16>
    %c0_1 = arith.constant 0 : index
    %c0_2 = arith.constant 0 : index
    %1 = vector.load %arg3[%c0_1, %c0_2] : memref<64x128xbf16, #tpu.memory_space<vmem>>, vector<64x128xbf16>
    %cst = arith.constant dense<0.000000e+00> : vector<24x128xf32>
    %2 = tpu.matmul %0, %1, %cst {dimension_numbers = #tpu.dot_dimension_numbers<[1], [0], [0], [1], [0, 0, 1, 1], [], []>} : vector<24x64xbf16>, vector<64x128xbf16>, vector<24x128xf32> -> vector<24x128xf32>
    %c0_3 = arith.constant 0 : index
    %c0_4 = arith.constant 0 : index
    %3 = vector.load %arg4[%c0_3, %c0_4] : memref<1x128xf32, #tpu.memory_space<vmem>>, vector<1x128xf32>
    %4 = vector.broadcast %3 : vector<1x128xf32> to vector<24x128xf32>
    %5 = arith.addf %2, %4 : vector<24x128xf32>
    %6 = arith.truncf %5 : vector<24x128xf32> to vector<24x128xbf16>
    %c0_5 = arith.constant 0 : index
    %c0_6 = arith.constant 0 : index
    %7 = vector.load %arg5[%c0_5, %c0_6] : memref<24x128xbf16, #tpu.memory_space<vmem>>, vector<24x128xbf16>
    tpu.vector_store %arg5[%c0_5, %c0_6], %6 {strides = array<i32>} : memref<24x128xbf16, #tpu.memory_space<vmem>>, vector<24x128xbf16>,
    return
  }
  func.func @transform_0(%arg0: i32, %arg1: i32) -> (i32, i32) {
    %c0_i32 = arith.constant 0 : i32
    %c0_i32_0 = arith.constant 0 : i32
    return %arg0, %c0_i32 : i32, i32
  }
  func.func @transform_1(%arg0: i32, %arg1: i32) -> (i32, i32) {
    %c0_i32 = arith.constant 0 : i32
    %c0_i32_0 = arith.constant 0 : i32
    return %c0_i32, %arg1 : i32, i32
  }
  func.func @transform_2(%arg0: i32, %arg1: i32) -> (i32, i32) {
    %c0_i32 = arith.constant 0 : i32
    %c0_i32_0 = arith.constant 0 : i32
    return %c0_i32, %arg1 : i32, i32
  }
  func.func @transform_3(%arg0: i32, %arg1: i32) -> (i32, i32) {
    %c0_i32 = arith.constant 0 : i32
    return %arg0, %arg1 : i32, i32
  }
}

module attributes {stable_mosaic.version = 11 : i64} {
  func.func @_matmul_bias_kernel(%arg0: i32, %arg1: i32, %arg2: memref<56x32xbf16, #tpu.memory_space<vmem>>, %arg3: memref<32x128xbf16, #tpu.memory_space<vmem>>, %arg4: memref<1x128xf32, #tpu.memory_space<vmem>>, %arg5: memref<56x128xbf16, #tpu.memory_space<vmem>>) attributes {dimension_semantics = [#tpu.dimension_semantics<parallel>, #tpu.dimension_semantics<parallel>], iteration_bounds = array<i64: 1, 1>, scalar_prefetch = 0 : i64, scratch_operands = 0 : i64, tpu.core_type = #tpu.core_type<tc>, window_params = [{transform_indices = @transform_0, window_bounds = array<i64: 56, 32>}, {transform_indices = @transform_1, window_bounds = array<i64: 32, 128>}, {transform_indices = @transform_2, window_bounds = array<i64: 1, 128>}, {transform_indices = @transform_3, window_bounds = array<i64: 56, 128>}]} {
    %c0 = arith.constant 0 : index
    %c0_0 = arith.constant 0 : index
    %0 = vector.load %arg2[%c0, %c0_0] : memref<56x32xbf16, #tpu.memory_space<vmem>>, vector<56x32xbf16>
    %c0_1 = arith.constant 0 : index
    %c0_2 = arith.constant 0 : index
    %1 = vector.load %arg3[%c0_1, %c0_2] : memref<32x128xbf16, #tpu.memory_space<vmem>>, vector<32x128xbf16>
    %cst = arith.constant dense<0.000000e+00> : vector<56x128xf32>
    %2 = tpu.matmul %0, %1, %cst {dimension_numbers = #tpu.dot_dimension_numbers<[1], [0], [0], [1], [0, 0, 1, 1], [], []>} : vector<56x32xbf16>, vector<32x128xbf16>, vector<56x128xf32> -> vector<56x128xf32>
    %c0_3 = arith.constant 0 : index
    %c0_4 = arith.constant 0 : index
    %3 = vector.load %arg4[%c0_3, %c0_4] : memref<1x128xf32, #tpu.memory_space<vmem>>, vector<1x128xf32>
    %4 = vector.broadcast %3 : vector<1x128xf32> to vector<56x128xf32>
    %5 = arith.addf %2, %4 : vector<56x128xf32>
    %6 = arith.truncf %5 : vector<56x128xf32> to vector<56x128xbf16>
    %c0_5 = arith.constant 0 : index
    %c0_6 = arith.constant 0 : index
    %7 = vector.load %arg5[%c0_5, %c0_6] : memref<56x128xbf16, #tpu.memory_space<vmem>>, vector<56x128xbf16>
    tpu.vector_store %arg5[%c0_5, %c0_6], %6 {strides = array<i32>} : memref<56x128xbf16, #tpu.memory_space<vmem>>, vector<56x128xbf16>,
    return
  }
  func.func @transform_0(%arg0: i32, %arg1: i32) -> (i32, i32) {
    %c0_i32 = arith.constant 0 : i32
    %c0_i32_0 = arith.constant 0 : i32
    return %arg0, %c0_i32 : i32, i32
  }
  func.func @transform_1(%arg0: i32, %arg1: i32) -> (i32, i32) {
    %c0_i32 = arith.constant 0 : i32
    %c0_i32_0 = arith.constant 0 : i32
    return %c0_i32, %arg1 : i32, i32
  }
  func.func @transform_2(%arg0: i32, %arg1: i32) -> (i32, i32) {
    %c0_i32 = arith.constant 0 : i32
    %c0_i32_0 = arith.constant 0 : i32
    return %c0_i32, %arg1 : i32, i32
  }
  func.func @transform_3(%arg0: i32, %arg1: i32) -> (i32, i32) {
    %c0_i32 = arith.constant 0 : i32
    return %arg0, %arg1 : i32, i32
  }
}

module attributes {stable_mosaic.version = 11 : i64} {
  func.func @_matmul_bias_kernel(%arg0: i32, %arg1: i32, %arg2: memref<168x16xbf16, #tpu.memory_space<vmem>>, %arg3: memref<16x128xbf16, #tpu.memory_space<vmem>>, %arg4: memref<1x128xf32, #tpu.memory_space<vmem>>, %arg5: memref<168x128xf32, #tpu.memory_space<vmem>>) attributes {dimension_semantics = [#tpu.dimension_semantics<parallel>, #tpu.dimension_semantics<parallel>], iteration_bounds = array<i64: 1, 1>, scalar_prefetch = 0 : i64, scratch_operands = 0 : i64, tpu.core_type = #tpu.core_type<tc>, window_params = [{transform_indices = @transform_0, window_bounds = array<i64: 168, 16>}, {transform_indices = @transform_1, window_bounds = array<i64: 16, 128>}, {transform_indices = @transform_2, window_bounds = array<i64: 1, 128>}, {transform_indices = @transform_3, window_bounds = array<i64: 168, 128>}]} {
    %c0 = arith.constant 0 : index
    %c0_0 = arith.constant 0 : index
    %0 = vector.load %arg2[%c0, %c0_0] : memref<168x16xbf16, #tpu.memory_space<vmem>>, vector<168x16xbf16>
    %c0_1 = arith.constant 0 : index
    %c0_2 = arith.constant 0 : index
    %1 = vector.load %arg3[%c0_1, %c0_2] : memref<16x128xbf16, #tpu.memory_space<vmem>>, vector<16x128xbf16>
    %cst = arith.constant dense<0.000000e+00> : vector<168x128xf32>
    %2 = tpu.matmul %0, %1, %cst {dimension_numbers = #tpu.dot_dimension_numbers<[1], [0], [0], [1], [0, 0, 1, 1], [], []>} : vector<168x16xbf16>, vector<16x128xbf16>, vector<168x128xf32> -> vector<168x128xf32>
    %c0_3 = arith.constant 0 : index
    %c0_4 = arith.constant 0 : index
    %3 = vector.load %arg4[%c0_3, %c0_4] : memref<1x128xf32, #tpu.memory_space<vmem>>, vector<1x128xf32>
    %4 = vector.broadcast %3 : vector<1x128xf32> to vector<168x128xf32>
    %5 = arith.addf %2, %4 : vector<168x128xf32>
    %c0_5 = arith.constant 0 : index
    %c0_6 = arith.constant 0 : index
    %6 = vector.load %arg5[%c0_5, %c0_6] : memref<168x128xf32, #tpu.memory_space<vmem>>, vector<168x128xf32>
    tpu.vector_store %arg5[%c0_5, %c0_6], %5 {strides = array<i32>} : memref<168x128xf32, #tpu.memory_space<vmem>>, vector<168x128xf32>,
    return
  }
  func.func @transform_0(%arg0: i32, %arg1: i32) -> (i32, i32) {
    %c0_i32 = arith.constant 0 : i32
    %c0_i32_0 = arith.constant 0 : i32
    return %arg0, %c0_i32 : i32, i32
  }
  func.func @transform_1(%arg0: i32, %arg1: i32) -> (i32, i32) {
    %c0_i32 = arith.constant 0 : i32
    %c0_i32_0 = arith.constant 0 : i32
    return %c0_i32, %arg1 : i32, i32
  }
  func.func @transform_2(%arg0: i32, %arg1: i32) -> (i32, i32) {
    %c0_i32 = arith.constant 0 : i32
    %c0_i32_0 = arith.constant 0 : i32
    return %c0_i32, %arg1 : i32, i32
  }
  func.func @transform_3(%arg0: i32, %arg1: i32) -> (i32, i32) {
    %c0_i32 = arith.constant 0 : i32
    return %arg0, %arg1 : i32, i32
  }
}

</mosaic_0001>

<bundles_post_ra>
// kernel: _lambda_.4
= control target key start
LH: loop header
LB: loop body
LE: loop exit
PB: predicated region body
PF: predicated region fallthrough
CT: control target
= control target key end

     0   :  { %v108_v0 = vmov 0.0   ;;  %vm109_vm0 = vmmov 0   ;;  %vm39_vm1 = vcmask 261120   ;;  %s145_s1 = inlined_call_operand.vmem [shape: bf16[32,128], index: 1, kind: input, shape index: {}]   ;;  %s146_s0 = inlined_call_operand.vmem [shape: bf16[8,32], index: 0, kind: input, shape index: {}]   ;;  %s147_s2 = inlined_call_operand.vmem [shape: f32[1,128], index: 2, kind: input, shape index: {}]   ;;  %s148_s3 = inlined_call_operand.vmem [shape: bf16[8,128], index: 3, kind: output, shape index: {}]  }
   0x1   :  { %96 = vmatprep.subr.bf16.mxu0 %v108_v0  ;;  %v106_v1 = vld [vmem:[%s145_s1] sm:$0xff]   ;;  %100 = vmatprep.mubr.msk.bf16.mxu0 %vm109_vm0, %v108_v0  ;;  %v107_v2 = vld [vmem:[%s145_s1 + $0x8] sm:$0xff]  }
   0x2   :  { %97 = vmatpush3.bf16.msra.mxu0 %v106_v1  ;;  %v15_v3 = vld [vmem:[%s146_s0] sm:$0xf] }
   0x3   :  { %98 = vmatprep.subr.bf16.mxu0 %v108_v0  ;;  %v89_v4 = vld [vmem:[%s147_s2] ss:$0 sm:$0xff] }
   0x6   :  { %99 = vmatpush3.bf16.msra.mxu0 %v107_v2 }
   0x9   :  { %101 = vmatmul.mubr.msk.bf16.vlgmr.msra.gmra.mrb[0].mxu0 %vm39_vm1, %v15_v3 }
  0xdc   :  { %v77_v5 = vpop.f32.mrb[0].mxu0 }
  0xdd   :  { %v78_v6 = vadd.f32 %v89_v4, %v77_v5  ;;  %v102_v7 = vpop.f32.mrb[1].mxu0 }
  0xde   :  { %v80_v8 = vpop.f32.mrb[2].mxu0 }
  0xdf   :  { %v83_v9 = vpack.c.bf16 %v78_v6, %v78_v6  ;;  %v103_v10 = vpop.f32.mrb[3].mxu0 }
  0xe1   :  { %84 = vst [vmem:[%s148_s3] sm:$0xf] %v83_v9 }

// kernel: _lambda_.5
= control target key start
LH: loop header
LB: loop body
LE: loop exit
PB: predicated region body
PF: predicated region fallthrough
CT: control target
= control target key end

     0   :  { %vm65_vm0 = vcmask 523264   ;;  %s231_s1 = inlined_call_operand.vmem [shape: bf16[64,128], index: 1, kind: input, shape index: {}]   ;;  %s232_s0 = inlined_call_operand.vmem [shape: bf16[24,64], index: 0, kind: input, shape index: {}]   ;;  %s233_s2 = inlined_call_operand.vmem [shape: f32[1,128], index: 2, kind: input, shape index: {}]   ;;  %s234_s3 = inlined_call_operand.vmem [shape: bf16[24,128], index: 3, kind: output, shape index: {}]  }
   0x1   :  { %v178_v0 = vld [vmem:[%s231_s1] sm:$0xff]   ;;  %v179_v1 = vld [vmem:[%s231_s1 + $0x8] sm:$0xff]   ;;  %v180_v2 = vld [vmem:[%s231_s1 + $0x10] sm:$0xff]  }
   0x2   :  { %166 = vmatprep.subr.bf16.mxu0 %v178_v0  ;;  %v182_v3 = vld [vmem:[%s232_s0] sm:$0xff]   ;;  %v181_v4 = vld [vmem:[%s231_s1 + $0x18] sm:$0xff]   ;;  %v183_v5 = vld [vmem:[%s232_s0 + $0x8] ss:$0 sps:$4 sm:$0xff]  }
   0x3   :  { %167 = vmatpush3.bf16.msra.mxu0 %v178_v0  ;;  %174 = vmatprep.mubr.msk.bf16.mxu0 %vm65_vm0, %v182_v3  ;;  %v140_v6 = vld [vmem:[%s233_s2] ss:$0 sm:$0xff] }
   0x4   :  { %168 = vmatprep.subr.bf16.mxu0 %v179_v1 }
   0x7   :  { %169 = vmatpush3.bf16.msra.mxu0 %v179_v1 }
   0x8   :  { %170 = vmatprep.subr.bf16.mxu0 %v180_v2 }
   0xb   :  { %171 = vmatpush3.bf16.msra.mxu0 %v180_v2 }
   0xc   :  { %172 = vmatprep.subr.bf16.mxu0 %v181_v4 }
   0xf   :  { %173 = vmatpush3.bf16.msra.mxu0 %v181_v4 }
  0x12   :  { %175 = vmatmul.mubr.msk.bf16.vlgmr.msra.gmra.mrb[0].mxu0 %vm65_vm0, %v183_v5 }
  0xe5   :  { %v176_v7 = vpop.f32.mrb[0].mxu0 }
  0xe6   :  { %v115_v8 = vadd.f32 %v176_v7, %v140_v6  ;;  %v106_v9 = vpop.f32.mrb[1].mxu0 }
  0xe7   :  { %v177_v10 = vpop.f32.mrb[2].mxu0  ;;  %v107_v13 = vadd.f32 %v140_v6, %v106_v9 }
  0xe8   :  { %v154_v11 = vpack.c.bf16 %v115_v8, %v115_v8  ;;  %v109_v12 = vpop.f32.mrb[3].mxu0 }
  0xe9   :  { %v110_v14 = vadd.f32 %v140_v6, %v109_v12 }
  0xea   :  { %135 = vst [vmem:[%s234_s3 + $0x8] sm:$0xf] %v154_v11 }
  0xeb   :  { %v158_v15 = vpack.c.bf16 %v110_v14, %v107_v13 }
  0xed   :  { %159 = vst [vmem:[%s234_s3] sm:$0xff] %v158_v15  }

// kernel: _lambda_.6
= control target key start
LH: loop header
LB: loop body
LE: loop exit
PB: predicated region body
PF: predicated region fallthrough
CT: control target
= control target key end

     0   :  { %vm63_vm0 = vcmask 261120   ;;  %s303_s1 = inlined_call_operand.vmem [shape: bf16[32,128], index: 1, kind: input, shape index: {}]   ;;  %s304_s0 = inlined_call_operand.vmem [shape: bf16[56,32], index: 0, kind: input, shape index: {}]   ;;  %s305_s2 = inlined_call_operand.vmem [shape: f32[1,128], index: 2, kind: input, shape index: {}]   ;;  %s306_s3 = inlined_call_operand.vmem [shape: bf16[56,128], index: 3, kind: output, shape index: {}]  }
   0x1   :  { %v244_v0 = vld [vmem:[%s303_s1] sm:$0xff]   ;;  %v245_v1 = vld [vmem:[%s303_s1 + $0x8] sm:$0xff]   ;;  %v247_v3 = vld [vmem:[%s304_s0 + $0x10] sm:$0xff]  }
   0x2   :  { %228 = vmatprep.subr.bf16.mxu0 %v244_v0  ;;  %240 = vmatprep.subr.bf16.mxu1 %v244_v0  ;;  %v246_v2 = vld [vmem:[%s304_s0] sm:$0xff]   ;;  %v248_v4 = vld [vmem:[%s304_s0 + $0x8] sm:$0xff]   ;;  %v249_v5 = vld [vmem:[%s304_s0 + $0x18] ss:$0 sps:$4 sm:$0xff]  }
   0x3   :  { %229 = vmatpush3.bf16.msra.mxu0 %v244_v0  ;;  %242 = vmatpush3.bf16.msra.mxu1 %v244_v0  ;;  %v180_v6 = vld [vmem:[%s305_s2] ss:$0 sm:$0xff] }
   0x4   :  { %230 = vmatprep.subr.bf16.mxu0 %v245_v1  ;;  %241 = vmatprep.subr.bf16.mxu1 %v245_v1 }
   0x5   :  { %232 = vmatprep.mubr.msk.bf16.mxu0 %vm63_vm0, %v246_v2  ;;  %236 = vmatprep.mubr.msk.bf16.mxu1 %vm63_vm0, %v247_v3 }
   0x7   :  { %231 = vmatpush3.bf16.msra.mxu0 %v245_v1  ;;  %243 = vmatpush3.bf16.msra.mxu1 %v245_v1 }
   0xa   :  { %233 = vmatmul.mubr.msk.bf16.vlgmr.msra.gmra.mrb[0].mxu0 %vm63_vm0, %v248_v4  ;;  %237 = vmatmul.mubr.msk.bf16.vlgmr.msra.gmra.mrb[0].mxu1 %vm63_vm0, %v249_v5 }
  0xdd   :  { %v234_v7 = vpop.f32.mrb[0].mxu0  ;;  %v238_v8 = vpop.f32.mrb[0].mxu1 }
  0xde   :  { %v135_v9 = vadd.f32 %v238_v8, %v180_v6  ;;  %v110_v10 = vpop.f32.mrb[1].mxu0  ;;  %v126_v11 = vpop.f32.mrb[1].mxu1  ;;  %v119_v14 = vadd.f32 %v234_v7, %v180_v6 }
  0xdf   :  { %v235_v12 = vpop.f32.mrb[2].mxu0  ;;  %v239_v13 = vpop.f32.mrb[2].mxu1  ;;  %v111_v19 = vadd.f32 %v180_v6, %v110_v10  ;;  %v127_v20 = vadd.f32 %v180_v6, %v126_v11 }
  0xe0   :  { %v204_v15 = vpack.c.bf16 %v135_v9, %v135_v9  ;;  %v122_v16 = vadd.f32 %v235_v12, %v180_v6  ;;  %v113_v17 = vpop.f32.mrb[3].mxu0  ;;  %v129_v18 = vpop.f32.mrb[3].mxu1 }
  0xe1   :  { %v114_v21 = vadd.f32 %v180_v6, %v113_v17  ;;  %v130_v22 = vadd.f32 %v180_v6, %v129_v18 }
  0xe2   :  { %175 = vst [vmem:[%s306_s3 + $0x18] sm:$0xf] %v204_v15  ;;  %v213_v23 = vpack.c.bf16 %v122_v16, %v119_v14 }
  0xe3   :  { %v208_v24 = vpack.c.bf16 %v114_v21, %v111_v19  ;;  %v218_v25 = vpack.c.bf16 %v130_v22, %v127_v20 }
  0xe4   :  { %220 = vst [vmem:[%s306_s3 + $0x8] sm:$0xff] %v213_v23  }
  0xe5   :  { %209 = vst [vmem:[%s306_s3] sm:$0xff] %v208_v24   ;;  %221 = vst [vmem:[%s306_s3 + $0x10] sm:$0xff] %v218_v25  }

// kernel: _lambda_.7
= control target key start
LH: loop header
LB: loop body
LE: loop exit
PB: predicated region body
PF: predicated region fallthrough
CT: control target
= control target key end

     0   :  { %v381_v0 = vmov 0.0   ;;  %vm382_vm0 = vmmov 0   ;;  %vm104_vm1 = vcmask 130048   ;;  %s550_s1 = inlined_call_operand.vmem [shape: bf16[16,128], index: 1, kind: input, shape index: {}]   ;;  %s551_s0 = inlined_call_operand.vmem [shape: bf16[168,16], index: 0, kind: input, shape index: {}]   ;;  %s552_s2 = inlined_call_operand.vmem [shape: f32[1,128], index: 2, kind: input, shape index: {}]   ;;  %s553_s3 = inlined_call_operand.vmem [shape: f32[168,128], index: 3, kind: output, shape index: {}]  }
   0x1   :  { %319 = vmatprep.subr.bf16.mxu0 %v381_v0  ;;  %v369_v1 = vld [vmem:[%s550_s1] sm:$0xff]   ;;  %321 = vmatprep.mubr.msk.bf16.mxu0 %vm382_vm0, %v381_v0  ;;  %v371_v3 = vld [vmem:[%s551_s0 + $0x30] sm:$0xff]   ;;  %v372_v4 = vld [vmem:[%s551_s0 + $0x8] sm:$0xff]  }
   0x2   :  { %v370_v2 = vld [vmem:[%s551_s0] sm:$0xff]   ;;  %365 = vmatprep.subr.bf16.mxu1 %v381_v0  ;;  %345 = vmatprep.mubr.msk.bf16.mxu1 %vm382_vm0, %v381_v0  ;;  %v373_v5 = vld [vmem:[%s551_s0 + $0x38] sm:$0xff]   ;;  %v374_v6 = vld [vmem:[%s551_s0 + $0x10] sm:$0xff]  }
   0x3   :  { %320 = vmatpush3.bf16.msra.mxu0 %v369_v1  ;;  %366 = vmatpush3.bf16.msra.mxu1 %v369_v1  ;;  %v375_v7 = vld [vmem:[%s551_s0 + $0x40] sm:$0xff]   ;;  %v376_v8 = vld [vmem:[%s551_s0 + $0x18] sm:$0xff]   ;;  %v377_v9 = vld [vmem:[%s551_s0 + $0x48] sm:$0xff]  }
   0x4   :  { %v378_v10 = vld [vmem:[%s551_s0 + $0x20] sm:$0xff]   ;;  %v379_v11 = vld [vmem:[%s551_s0 + $0x50] ss:$0 sps:$4 sm:$0xff]   ;;  %v380_v12 = vld [vmem:[%s551_s0 + $0x28] sm:$0xff]  }
   0x5   :  { %v464_v13 = vld [vmem:[%s552_s2] ss:$0 sm:$0xff] }
   0x6   :  { %322 = vmatmul.mubr.msk.bf16.vlgmr.msra.gmra.mrb[0].mxu0 %vm104_vm1, %v370_v2  ;;  %346 = vmatmul.mubr.msk.bf16.vlgmr.msra.gmra.mrb[0].mxu1 %vm104_vm1, %v371_v3 }
   0x7   :  { %325 = vmatprep.mubr.msk.bf16.mxu0 %vm382_vm0, %v381_v0  ;;  %349 = vmatprep.mubr.msk.bf16.mxu1 %vm382_vm0, %v381_v0 }
   0xe   :  { %326 = vmatmul.mubr.msk.bf16.gmra.mrb[4].mxu0 %vm104_vm1, %v372_v4  ;;  %350 = vmatmul.mubr.msk.bf16.gmra.mrb[4].mxu1 %vm104_vm1, %v373_v5 }
   0xf   :  { %329 = vmatprep.mubr.msk.bf16.mxu0 %vm382_vm0, %v381_v0  ;;  %353 = vmatprep.mubr.msk.bf16.mxu1 %vm382_vm0, %v381_v0 }
  0x16   :  { %330 = vmatmul.mubr.msk.bf16.gmra.mrb[8].mxu0 %vm104_vm1, %v374_v6  ;;  %354 = vmatmul.mubr.msk.bf16.gmra.mrb[8].mxu1 %vm104_vm1, %v375_v7 }
  0x17   :  { %333 = vmatprep.mubr.msk.bf16.mxu0 %vm382_vm0, %v381_v0  ;;  %357 = vmatprep.mubr.msk.bf16.mxu1 %vm382_vm0, %v381_v0 }
  0x1e   :  { %334 = vmatmul.mubr.msk.bf16.gmra.mrb[12].mxu0 %vm104_vm1, %v376_v8  ;;  %358 = vmatmul.mubr.msk.bf16.gmra.mrb[12].mxu1 %vm104_vm1, %v377_v9 }
  0x1f   :  { %337 = vmatprep.mubr.msk.bf16.mxu0 %vm382_vm0, %v381_v0  ;;  %361 = vmatprep.mubr.msk.bf16.mxu1 %vm382_vm0, %v381_v0 }
  0x26   :  { %338 = vmatmul.mubr.msk.bf16.gmra.mrb[16].mxu0 %vm104_vm1, %v378_v10  ;;  %362 = vmatmul.mubr.msk.bf16.gmra.mrb[16].mxu1 %vm104_vm1, %v379_v11 }
  0x27   :  { %341 = vmatprep.mubr.msk.bf16.mxu0 %vm382_vm0, %v381_v0 }
  0x2e   :  { %342 = vmatmul.mubr.msk.bf16.gmra.mrb[20].mxu0 %vm104_vm1, %v380_v12 }
  0xd9   :  { %v172_v14 = vpop.f32.mrb[0].mxu0  ;;  %v220_v15 = vpop.f32.mrb[0].mxu1 }
  0xda   :  { %v173_v16 = vadd.f32 %v464_v13, %v172_v14  ;;  %v323_v17 = vpop.f32.mrb[1].mxu0  ;;  %v221_v18 = vadd.f32 %v464_v13, %v220_v15  ;;  %v347_v19 = vpop.f32.mrb[1].mxu1 }
  0xdb   :  { %v175_v20 = vpop.f32.mrb[2].mxu0  ;;  %v223_v21 = vpop.f32.mrb[2].mxu1 }
  0xdc   :  { %258 = vst [vmem:[%s553_s3] sm:$0xff] %v173_v16  ;;  %v176_v22 = vadd.f32 %v464_v13, %v175_v20  ;;  %v324_v23 = vpop.f32.mrb[3].mxu0  ;;  %270 = vst [vmem:[%s553_s3 + $0x60] sm:$0xff] %v221_v18  ;;  %v224_v24 = vadd.f32 %v464_v13, %v223_v21  ;;  %v348_v25 = vpop.f32.mrb[3].mxu1 }
  0xde   :  { %259 = vst [vmem:[%s553_s3 + $0x8] sm:$0xff] %v176_v22  ;;  %271 = vst [vmem:[%s553_s3 + $0x68] sm:$0xff] %v224_v24 }
  0xe1   :  { %v180_v26 = vpop.f32.mrb[4].mxu0  ;;  %v228_v27 = vpop.f32.mrb[4].mxu1 }
  0xe2   :  { %v181_v28 = vadd.f32 %v464_v13, %v180_v26  ;;  %v327_v29 = vpop.f32.mrb[5].mxu0  ;;  %v229_v30 = vadd.f32 %v464_v13, %v228_v27  ;;  %v351_v31 = vpop.f32.mrb[5].mxu1 }
  0xe3   :  { %v183_v32 = vpop.f32.mrb[6].mxu0  ;;  %v231_v33 = vpop.f32.mrb[6].mxu1 }
  0xe4   :  { %260 = vst [vmem:[%s553_s3 + $0x10] sm:$0xff] %v181_v28  ;;  %v184_v34 = vadd.f32 %v464_v13, %v183_v32  ;;  %v328_v35 = vpop.f32.mrb[7].mxu0  ;;  %272 = vst [vmem:[%s553_s3 + $0x70] sm:$0xff] %v229_v30  ;;  %v232_v36 = vadd.f32 %v464_v13, %v231_v33  ;;  %v352_v37 = vpop.f32.mrb[7].mxu1 }
  0xe6   :  { %261 = vst [vmem:[%s553_s3 + $0x18] sm:$0xff] %v184_v34  ;;  %273 = vst [vmem:[%s553_s3 + $0x78] sm:$0xff] %v232_v36 }
  0xe9   :  { %v188_v38 = vpop.f32.mrb[8].mxu0  ;;  %v236_v39 = vpop.f32.mrb[8].mxu1 }
  0xea   :  { %v189_v40 = vadd.f32 %v464_v13, %v188_v38  ;;  %v331_v41 = vpop.f32.mrb[9].mxu0  ;;  %v237_v42 = vadd.f32 %v464_v13, %v236_v39  ;;  %v355_v43 = vpop.f32.mrb[9].mxu1 }
  0xeb   :  { %v191_v44 = vpop.f32.mrb[10].mxu0  ;;  %v239_v45 = vpop.f32.mrb[10].mxu1 }
  0xec   :  { %262 = vst [vmem:[%s553_s3 + $0x20] sm:$0xff] %v189_v40  ;;  %v192_v46 = vadd.f32 %v464_v13, %v191_v44  ;;  %v332_v47 = vpop.f32.mrb[11].mxu0  ;;  %274 = vst [vmem:[%s553_s3 + $0x80] sm:$0xff] %v237_v42  ;;  %v240_v48 = vadd.f32 %v464_v13, %v239_v45  ;;  %v356_v49 = vpop.f32.mrb[11].mxu1 }
  0xee   :  { %263 = vst [vmem:[%s553_s3 + $0x28] sm:$0xff] %v192_v46  ;;  %275 = vst [vmem:[%s553_s3 + $0x88] sm:$0xff] %v240_v48 }
  0xf1   :  { %v196_v50 = vpop.f32.mrb[12].mxu0  ;;  %v244_v51 = vpop.f32.mrb[12].mxu1 }
  0xf2   :  { %v197_v52 = vadd.f32 %v464_v13, %v196_v50  ;;  %v335_v53 = vpop.f32.mrb[13].mxu0  ;;  %v245_v54 = vadd.f32 %v464_v13, %v244_v51  ;;  %v359_v55 = vpop.f32.mrb[13].mxu1 }
  0xf3   :  { %v199_v56 = vpop.f32.mrb[14].mxu0  ;;  %v247_v57 = vpop.f32.mrb[14].mxu1 }
  0xf4   :  { %264 = vst [vmem:[%s553_s3 + $0x30] sm:$0xff] %v197_v52  ;;  %v200_v58 = vadd.f32 %v464_v13, %v199_v56  ;;  %v336_v59 = vpop.f32.mrb[15].mxu0  ;;  %276 = vst [vmem:[%s553_s3 + $0x90] sm:$0xff] %v245_v54  ;;  %v248_v60 = vadd.f32 %v464_v13, %v247_v57  ;;  %v360_v61 = vpop.f32.mrb[15].mxu1 }
  0xf6   :  { %265 = vst [vmem:[%s553_s3 + $0x38] sm:$0xff] %v200_v58  ;;  %277 = vst [vmem:[%s553_s3 + $0x98] sm:$0xff] %v248_v60 }
  0xf9   :  { %v204_v62 = vpop.f32.mrb[16].mxu0  ;;  %v252_v63 = vpop.f32.mrb[16].mxu1 }
  0xfa   :  { %v205_v0 = vadd.f32 %v464_v13, %v204_v62  ;;  %v339_v1 = vpop.f32.mrb[17].mxu0  ;;  %v253_v2 = vadd.f32 %v464_v13, %v252_v63  ;;  %v363_v3 = vpop.f32.mrb[17].mxu1 }
  0xfb   :  { %v207_v4 = vpop.f32.mrb[18].mxu0  ;;  %v255_v5 = vpop.f32.mrb[18].mxu1 }
  0xfc   :  { %266 = vst [vmem:[%s553_s3 + $0x40] sm:$0xff] %v205_v0  ;;  %v208_v6 = vadd.f32 %v464_v13, %v207_v4  ;;  %v340_v7 = vpop.f32.mrb[19].mxu0  ;;  %278 = vst [vmem:[%s553_s3 + $0xa0] sm:$0xff] %v253_v2  ;;  %v364_v8 = vpop.f32.mrb[19].mxu1 }
  0xfe   :  { %267 = vst [vmem:[%s553_s3 + $0x48] sm:$0xff] %v208_v6 }
 0x101   :  { %v212_v9 = vpop.f32.mrb[20].mxu0 }
 0x102   :  { %v213_v10 = vadd.f32 %v464_v13, %v212_v9  ;;  %v343_v11 = vpop.f32.mrb[21].mxu0 }
 0x103   :  { %v215_v12 = vpop.f32.mrb[22].mxu0 }
 0x104   :  { %268 = vst [vmem:[%s553_s3 + $0x50] sm:$0xff] %v213_v10  ;;  %v216_v14 = vadd.f32 %v464_v13, %v215_v12  ;;  %v344_v15 = vpop.f32.mrb[23].mxu0 }
 0x106   :  { %269 = vst [vmem:[%s553_s3 + $0x58] sm:$0xff] %v216_v14 }

</bundles_post_ra>
